<compile_context>
chip_gen: v6e
topology: v6e:2x2x1
jax: 0.10.0
libtpu: 0.0.40
codegen_flags: <defaults>
</compile_context>

<pallas_src>
import functools

import jax
import jax.numpy as jnp
import numpy as np
from jax import lax
from jax.experimental import pallas as pl
from jax.experimental.pallas import tpu as pltpu

_LANE = 128


def _cdiv(a, b):
    return -(-a // b)


def _round_up(a, b):
    return _cdiv(a, b) * b


# ---------------------------------------------------------------------------
# Pallas kernel: one (batch-block, spatial-tile) step of the 1x1 conv.
#   x_ref : (bn, Cin, TM)        activation tile (spatial on lanes)
#   w_ref : (Cout, Cin)  mxu dt  full weight (resident across grid steps)
#   b_ref : (Cout, 1)    f32     bias
#   o_ref : (bn, Cout, TM)       output tile (lane-dense stores)
# ---------------------------------------------------------------------------
def _outconv_kernel(x_ref, w_ref, b_ref, o_ref, *, bn):
    w = w_ref[...]
    b = b_ref[...]
    for i in range(bn):                                   # static unroll, bn small
        x = x_ref[i].astype(w.dtype)                      # (Cin, TM) VPU cast
        acc = jnp.dot(w, x, preferred_element_type=jnp.float32)  # (Cout, TM) f32
        o_ref[i] = (acc + b).astype(o_ref.dtype)          # f32 epilogue


def out_conv(x_nchw, weight, bias, *, out_dtype=None, mxu_dtype=jnp.bfloat16,
             vmem_budget_bytes=None, max_batch_block=16):
    """1x1 Conv2d (OutConv.forward).

    x_nchw : (N, Cin, H, W)
    weight : (Cout, Cin, 1, 1)  (PyTorch layout)
    bias   : (Cout,)
    returns (N, Cout, H, W) in `out_dtype` (defaults to x dtype).
    """
    N, Cin, H, W = x_nchw.shape
    Cout = weight.shape[0]
    HW = H * W
    if out_dtype is None:
        out_dtype = x_nchw.dtype

    x3 = x_nchw.reshape(N, Cin, HW)                       # free reshape (contiguous)
    w2 = weight.reshape(Cout, Cin).astype(mxu_dtype)      # tiny, cast once
    b2 = bias.reshape(Cout, 1).astype(jnp.float32)

    # ---- generation-aware VMEM / tile budgeting ---------------------------
    try:
        phys_vmem = int(getattr(pltpu.get_tpu_info(), "vmem_capacity_bytes", 0))
    except Exception:
        phys_vmem = 0
    if phys_vmem <= 0:
        phys_vmem = 64 << 20              # v7x has the smallest physical VMEM
    if vmem_budget_bytes is None:
        # double-buffered working set: half of physical VMEM, at most 32 MiB
        vmem_budget_bytes = min(phys_vmem // 2, 32 << 20)

    x_isz = jnp.dtype(x3.dtype).itemsize
    o_isz = jnp.dtype(out_dtype).itemsize
    m_isz = jnp.dtype(mxu_dtype).itemsize
    # Per spatial lane, per image, per step: double-buffered in/out pipeline
    # buffers plus in-kernel temporaries (mxu-dtype x copy, f32 acc, epilogue).
    bytes_per_lane = (2 * Cin * x_isz + 2 * Cout * o_isz
                      + Cin * m_isz + Cout * 4 + Cout * o_isz)
    max_lanes = max(_LANE, (vmem_budget_bytes // bytes_per_lane) // _LANE * _LANE)

    hw128 = _round_up(HW, _LANE)          # lane-padded footprint of one image

    if hw128 <= max_lanes:
        # Whole image fits in one step: block the batch axis instead so each
        # DMA step amortizes the fixed per-step cost over several images.
        tile_m = HW                       # == full array dim -> always legal
        bn = max(1, min(N, max_batch_block, max_lanes // hw128))
        gs = 1
    else:
        # Large image: spatial tiling.  Pad granularity is 128 lanes, not
        # tile_m; the ragged tail is a Pallas remainder block (no jnp.pad or
        # post-slice HBM passes).
        bn = 1
        n_tiles = _cdiv(hw128, max_lanes)
        tile_m = _round_up(_cdiv(hw128, n_tiles), _LANE)
        gs = _cdiv(HW, tile_m)
    gb = _cdiv(N, bn)

    # v7x has two TensorCores: avoid a degenerate single-step grid when there
    # is a non-trivial amount of work to split across them.
    if gb * gs == 1 and N * hw128 >= 32 * _LANE:
        if bn > 1:
            bn = _cdiv(bn, 2)
            gb = _cdiv(N, bn)
        elif HW >= 2 * _LANE:
            tile_m = _round_up(_cdiv(HW, 2), _LANE)
            gs = _cdiv(HW, tile_m)

    est_step_vmem = bn * _round_up(tile_m, _LANE) * bytes_per_lane
    vmem_limit = int(max(16 << 20,
                         min(phys_vmem - (4 << 20),
                             max(32 << 20, (est_step_vmem * 3) // 2))))

    kernel = functools.partial(_outconv_kernel, bn=bn)

    out = pl.pallas_call(
        kernel,
        out_shape=jax.ShapeDtypeStruct((N, Cout, HW), out_dtype),
        grid_spec=pltpu.PrefetchScalarGridSpec(
            num_scalar_prefetch=0,
            grid=(gb, gs),
            in_specs=[
                pl.BlockSpec((bn, Cin, tile_m), lambda nb, j: (nb, 0, j)),
                pl.BlockSpec((Cout, Cin), lambda nb, j: (0, 0)),
                pl.BlockSpec((Cout, 1), lambda nb, j: (0, 0)),
            ],
            out_specs=pl.BlockSpec((bn, Cout, tile_m), lambda nb, j: (nb, 0, j)),
        ),
        compiler_params=pltpu.CompilerParams(
            dimension_semantics=("parallel", "parallel"),
            vmem_limit_bytes=vmem_limit),
    )(x3, w2, b2)

    return out.reshape(N, Cout, H, W)


# ---------------------------------------------------------------------------
if __name__ == "__main__":
    key = jax.random.PRNGKey(0)
    kx, kw, kb = jax.random.split(key, 3)

    # OutConv(in_channels=4, out_channels=8) on a (2, 4, 16, 16) input.
    B, CIN, H, W = 2, 4, 16, 16
    COUT = 8

    x = jax.random.normal(kx, (B, CIN, H, W), jnp.float32)
    weight = (jax.random.normal(kw, (COUT, CIN, 1, 1), jnp.float32)
              * (1.0 / np.sqrt(CIN)))
    bias = 0.1 * jax.random.normal(kb, (COUT,), jnp.float32)

    fwd = jax.jit(out_conv)
    y = fwd(x, weight, bias)
    jax.block_until_ready(y)

    assert y.shape == (B, COUT, H, W), y.shape

    # Reference with the same bf16 operand quantization (kernel accumulates in
    # f32 on the MXU), so only summation order differs -> tight tolerances.
    # Pass mxu_dtype=jnp.float32 to out_conv for bit-closer parity with
    # PyTorch's f32 Conv2d if required.
    w_q = weight.reshape(COUT, CIN).astype(jnp.bfloat16).astype(jnp.float32)
    x_q = x.astype(jnp.bfloat16).astype(jnp.float32)
    ref = jnp.einsum("oc,nchw->nohw", w_q, x_q,
                     precision=lax.Precision.HIGHEST)
    ref = ref + bias[None, :, None, None]
    np.testing.assert_allclose(np.asarray(y), np.asarray(ref),
                               rtol=1e-4, atol=1e-4)

    print("KERNEL_OK")
</pallas_src>

<mosaic_0001>
module attributes {stable_mosaic.version = 11 : i64} {
  func.func @_outconv_kernel(%arg0: i32, %arg1: i32, %arg2: memref<2x4x256xf32, #tpu.memory_space<vmem>>, %arg3: memref<8x4xbf16, #tpu.memory_space<vmem>>, %arg4: memref<8x1xf32, #tpu.memory_space<vmem>>, %arg5: memref<2x8x256xf32, #tpu.memory_space<vmem>>) attributes {dimension_semantics = [#tpu.dimension_semantics<parallel>, #tpu.dimension_semantics<parallel>], iteration_bounds = array<i64: 1, 1>, scalar_prefetch = 0 : i64, scratch_operands = 0 : i64, tpu.core_type = #tpu.core_type<tc>, window_params = [{transform_indices = @transform_0, window_bounds = array<i64: 2, 4, 256>}, {pipeline_mode = #tpu.pipeline_mode<synchronous>, transform_indices = @transform_1, window_bounds = array<i64: 8, 4>}, {pipeline_mode = #tpu.pipeline_mode<synchronous>, transform_indices = @transform_2, window_bounds = array<i64: 8, 1>}, {transform_indices = @transform_3, window_bounds = array<i64: 2, 8, 256>}]} {
    %c0 = arith.constant 0 : index
    %c0_0 = arith.constant 0 : index
    %0 = vector.load %arg3[%c0, %c0_0] : memref<8x4xbf16, #tpu.memory_space<vmem>>, vector<8x4xbf16>
    %c0_1 = arith.constant 0 : index
    %c0_2 = arith.constant 0 : index
    %1 = vector.load %arg4[%c0_1, %c0_2] : memref<8x1xf32, #tpu.memory_space<vmem>>, vector<8x1xf32>
    %c0_3 = arith.constant 0 : index
    %c0_4 = arith.constant 0 : index
    %c0_5 = arith.constant 0 : index
    %2 = vector.load %arg2[%c0_3, %c0_4, %c0_5] : memref<2x4x256xf32, #tpu.memory_space<vmem>>, vector<1x4x256xf32>
    %3 = vector.shape_cast %2 : vector<1x4x256xf32> to vector<4x256xf32>
    %4 = arith.truncf %3 : vector<4x256xf32> to vector<4x256xbf16>
    %cst = arith.constant dense<0.000000e+00> : vector<8x256xf32>
    %5 = tpu.matmul %0, %4, %cst {dimension_numbers = #tpu.dot_dimension_numbers<[1], [0], [0], [1], [0, 0, 1, 1], [], []>} : vector<8x4xbf16>, vector<4x256xbf16>, vector<8x256xf32> -> vector<8x256xf32>
    %6 = vector.broadcast %1 : vector<8x1xf32> to vector<8x256xf32>
    %7 = arith.addf %5, %6 : vector<8x256xf32>
    %c0_6 = arith.constant 0 : index
    %c0_7 = arith.constant 0 : index
    %c0_8 = arith.constant 0 : index
    %8 = vector.load %arg5[%c0_6, %c0_7, %c0_8] : memref<2x8x256xf32, #tpu.memory_space<vmem>>, vector<1x8x256xf32>
    %9 = vector.shape_cast %8 : vector<1x8x256xf32> to vector<8x256xf32>
    %10 = vector.shape_cast %7 : vector<8x256xf32> to vector<1x8x256xf32>
    tpu.vector_store %arg5[%c0_6, %c0_7, %c0_8], %10 {strides = array<i32>} : memref<2x8x256xf32, #tpu.memory_space<vmem>>, vector<1x8x256xf32>,
    %c1 = arith.constant 1 : index
    %c0_9 = arith.constant 0 : index
    %c0_10 = arith.constant 0 : index
    %11 = vector.load %arg2[%c1, %c0_9, %c0_10] : memref<2x4x256xf32, #tpu.memory_space<vmem>>, vector<1x4x256xf32>
    %12 = vector.shape_cast %11 : vector<1x4x256xf32> to vector<4x256xf32>
    %13 = arith.truncf %12 : vector<4x256xf32> to vector<4x256xbf16>
    %cst_11 = arith.constant dense<0.000000e+00> : vector<8x256xf32>
    %14 = tpu.matmul %0, %13, %cst_11 {dimension_numbers = #tpu.dot_dimension_numbers<[1], [0], [0], [1], [0, 0, 1, 1], [], []>} : vector<8x4xbf16>, vector<4x256xbf16>, vector<8x256xf32> -> vector<8x256xf32>
    %15 = vector.broadcast %1 : vector<8x1xf32> to vector<8x256xf32>
    %16 = arith.addf %14, %15 : vector<8x256xf32>
    %c1_12 = arith.constant 1 : index
    %c0_13 = arith.constant 0 : index
    %c0_14 = arith.constant 0 : index
    %17 = vector.load %arg5[%c1_12, %c0_13, %c0_14] : memref<2x8x256xf32, #tpu.memory_space<vmem>>, vector<1x8x256xf32>
    %18 = vector.shape_cast %17 : vector<1x8x256xf32> to vector<8x256xf32>
    %19 = vector.shape_cast %16 : vector<8x256xf32> to vector<1x8x256xf32>
    tpu.vector_store %arg5[%c1_12, %c0_13, %c0_14], %19 {strides = array<i32>} : memref<2x8x256xf32, #tpu.memory_space<vmem>>, vector<1x8x256xf32>,
    return
  }
  func.func @transform_0(%arg0: i32, %arg1: i32) -> (i32, i32, i32) {
    %c0_i32 = arith.constant 0 : i32
    %c0_i32_0 = arith.constant 0 : i32
    return %arg0, %c0_i32, %arg1 : i32, i32, i32
  }
  func.func @transform_1(%arg0: i32, %arg1: i32) -> (i32, i32) {
    %c0_i32 = arith.constant 0 : i32
    %c0_i32_0 = arith.constant 0 : i32
    %c0_i32_1 = arith.constant 0 : i32
    return %c0_i32, %c0_i32_0 : i32, i32
  }
  func.func @transform_2(%arg0: i32, %arg1: i32) -> (i32, i32) {
    %c0_i32 = arith.constant 0 : i32
    %c0_i32_0 = arith.constant 0 : i32
    %c0_i32_1 = arith.constant 0 : i32
    return %c0_i32, %c0_i32_0 : i32, i32
  }
  func.func @transform_3(%arg0: i32, %arg1: i32) -> (i32, i32, i32) {
    %c0_i32 = arith.constant 0 : i32
    %c0_i32_0 = arith.constant 0 : i32
    return %arg0, %c0_i32, %arg1 : i32, i32, i32
  }
}

</mosaic_0001>

<bundles_post_ra>
// kernel: out_conv.1
= control target key start
LH: loop header
LB: loop body
LE: loop exit
PB: predicated region body
PF: predicated region fallthrough
CT: control target
= control target key end

     0   :  { %vm32_vm0 = vcmask 1041408   ;;  %v154_v2 = vmov 0   ;;  %vm28_vm1 = vcmask 31744   ;;  %s203_s0 = inlined_call_operand.vmem [shape: f32[2,4,256], index: 0, kind: input, shape index: {}]   ;;  %s204_s2 = inlined_call_operand.vmem [shape: f32[8,1], index: 2, kind: input, shape index: {}]   ;;  %s205_s1 = inlined_call_operand.vmem [shape: bf16[8,4], index: 1, kind: input, shape index: {}]   ;;  %s206_s3 = inlined_call_operand.vmem [shape: f32[2,8,256], index: 3, kind: output, shape index: {}]  }
   0x1   :  { %v17_v0 = vld [vmem:[%s203_s0] sm:$0xff]  ;;  %v145_v1 = vld [vmem:[%s203_s0 + $0x8] sm:$0xff]  ;;  %71 = vmatprep.mubr.bf16.mxu0 %v154_v2  ;;  %127 = vmatprep.mubr.bf16.mxu1 %v154_v2 }
   0x2   :  { %v19_v3 = vcombine.high %v17_v0, %v17_v0  ;;  %v85_v4 = vcombine.high %v145_v1, %v145_v1  ;;  %v21_v5 = vpack.c.bf16 %v17_v0, %v17_v0  ;;  %v87_v6 = vpack.c.bf16 %v145_v1, %v145_v1  ;;  %151 = vset.pattern.permute.xlu0 %v154_v2  ;;  %v16_v7 = vld [vmem:[%s204_s2] sm:$0xff] }
   0x3   :  { %25 = vperm.xlu0 %151, %v16_v7   ;;  %v15_v12 = vld [vmem:[%s205_s1] sm:$0xf] }
   0x4   :  { %v22_v8 = vpack.c.bf16 %v19_v3, %v19_v3  ;;  %v88_v9 = vpack.c.bf16 %v85_v4, %v85_v4  ;;  %v34_v10 = vsel %vm32_vm0, %v21_v5, 0  ;;  %v90_v11 = vsel %vm32_vm0, %v87_v6, 0 }
   0x6   :  { %143 = vmatprep.subr.msk.bf16.mxu0 %vm32_vm0, %v22_v8  ;;  %146 = vmatprep.subr.msk.bf16.mxu1 %vm32_vm0, %v88_v9 }
   0x7   :  { %54 = vmatpush1.bf16.msra.mxu0 %v34_v10  ;;  %110 = vmatpush1.bf16.msra.mxu1 %v90_v11 }
   0xa   :  { %144 = vmatmul.mubr.msk.bf16.vlgmr.msra.gmra.mxu0 %vm28_vm1, %v15_v12  ;;  %147 = vmatmul.mubr.msk.bf16.vlgmr.msra.gmra.mxu1 %vm28_vm1, %v15_v12 }
  0x7e   :  { %v26_v13 = vpop.permute.xlu0 %25 }
  0xca   :  { %v73_v14 = vpop.f32.mrf.mxu0  ;;  %v129_v15 = vpop.f32.mrf.mxu1 }
  0xcb   :  { %v74_v16 = vadd.f32 %v73_v14, %v26_v13  ;;  %v130_v17 = vadd.f32 %v129_v15, %v26_v13 }
  0xcc   :  { %v75_v18 = vpop.f32.mrf.mxu0  ;;  %v131_v19 = vpop.f32.mrf.mxu1 }
  0xcd   :  { %80 = vst [vmem:[%s206_s3] sm:$0xff] %v74_v16  ;;  %148 = vst [vmem:[%s206_s3 + $0x10] sm:$0xff] %v130_v17  ;;  %v76_v20 = vadd.f32 %v75_v18, %v26_v13  ;;  %v132_v21 = vadd.f32 %v131_v19, %v26_v13 }
  0xce   :  { %v77_v22 = vpop.f32.mrf.mxu0  ;;  %v133_v23 = vpop.f32.mrf.mxu1 }
  0xcf   :  { %81 = vst [vmem:[%s206_s3 + $0x8] sm:$0xff] %v76_v20  ;;  %149 = vst [vmem:[%s206_s3 + $0x18] sm:$0xff] %v132_v21 }
  0xd0   :  { %v78_v24 = vpop.f32.mrf.mxu0  ;;  %v134_v25 = vpop.f32.mrf.mxu1 }

</bundles_post_ra>
